<compile_context>
chip_gen: v7x
topology: tpu7x:2x2x1
jax: 0.10.0
libtpu: 0.0.40
codegen_flags: <defaults>
</compile_context>

<pallas_src>
import functools

import jax
import jax.numpy as jnp
from jax.experimental import pallas as pl
from jax.experimental.pallas import tpu as pltpu

EPS = 1e-5  # nn.LayerNorm default
VMEM_LIMIT_BYTES = 48 * 1024 * 1024  # explicit scoped-VMEM budget (safe on v5e/v6e/v7x)


def _layernorm(x, g, b):
    mean = jnp.mean(x, axis=-1, keepdims=True)
    var = jnp.mean((x - mean) ** 2, axis=-1, keepdims=True)
    return (x - mean) * jax.lax.rsqrt(var + EPS) * g + b


def _full_spec(a):
    """Full-array (resident) BlockSpec for a weight, for a 1-D grid."""
    zeros = (0,) * a.ndim
    return pl.BlockSpec(a.shape, lambda b, zeros=zeros: zeros)


def _pick_tile(n, candidates):
    for c in candidates:
        if n % c == 0:
            return c
    return n


def transformer_block_kernel(num_heads,
                             x_ref,
                             wqkv_ref, bqkv_ref,
                             wo3_ref, bo_ref,
                             g1_ref, be1_ref,
                             w1_ref, b1_ref, w2_ref, b2_ref,
                             g2_ref, be2_ref,
                             out_ref):
    """One TransformerBlock for a single batch element: MHSA -> add&LN -> FF -> add&LN."""
    x = x_ref[0]                                    # (S, E) f32
    S, E = x.shape
    H = num_heads
    D = E // H
    inv_scale = jnp.float32(1.0 / float(D) ** 0.5)

    xb = x.astype(jnp.bfloat16)

    # Fused Q|K|V projection: one MXU matmul with 3x wider N.
    qkv = jnp.dot(xb, wqkv_ref[...],
                  preferred_element_type=jnp.float32) + bqkv_ref[...]   # (S, 3E) f32

    # Head-major stacks (H, S, D) — static lane slices + stack on the leading
    # (major) axis; no minor-dim reshapes needed.
    q = jnp.stack([qkv[:, h * D:(h + 1) * D] for h in range(H)],
                  axis=0).astype(jnp.bfloat16)
    k = jnp.stack([qkv[:, E + h * D:E + (h + 1) * D] for h in range(H)],
                  axis=0).astype(jnp.bfloat16)
    v = jnp.stack([qkv[:, 2 * E + h * D:2 * E + (h + 1) * D] for h in range(H)],
                  axis=0).astype(jnp.bfloat16)

    # energy[h, q, k] = <q_hq, k_hk> / sqrt(D)   (batched over heads)
    e = jnp.einsum('hqd,hkd->hqk', q, k,
                   preferred_element_type=jnp.float32) * inv_scale      # (H, S, S) f32
    e = e - jnp.max(e, axis=-1, keepdims=True)
    p = jnp.exp(e)
    p = p * pl.reciprocal(jnp.sum(p, axis=-1, keepdims=True), approx=True)

    o = jnp.einsum('hqk,hkd->hqd', p.astype(jnp.bfloat16), v,
                   preferred_element_type=jnp.float32)                  # (H, S, D) f32

    # Output projection with the head-merge folded in:
    #   attn[s, e] = sum_h (o[h] @ Wo[h*D:(h+1)*D, :])[s, e]
    attn_h = jnp.einsum('hsd,hde->hse', o.astype(jnp.bfloat16), wo3_ref[...],
                        preferred_element_type=jnp.float32)             # (H, S, E)
    attn = jnp.sum(attn_h, axis=0) + bo_ref[...]                        # (S, E) f32

    # Residual + LayerNorm 1 (f32).
    x1 = _layernorm(attn + x, g1_ref[...], be1_ref[...])

    # FeedForward (dropout = identity in eval mode).
    h1 = jnp.dot(x1.astype(jnp.bfloat16), w1_ref[...],
                 preferred_element_type=jnp.float32) + b1_ref[...]
    h1 = jnp.maximum(h1, 0.0)
    ff = jnp.dot(h1.astype(jnp.bfloat16), w2_ref[...],
                 preferred_element_type=jnp.float32) + b2_ref[...]

    # Residual + LayerNorm 2 (f32).
    out_ref[0] = _layernorm(ff + x1, g2_ref[...], be2_ref[...])


def linear_kernel(x_ref, w_ref, b_ref, out_ref):
    """Tiled vocab projection tile: (tm, E) @ (E, tv) + (1, tv)."""
    out_ref[...] = (jnp.dot(x_ref[...].astype(jnp.bfloat16), w_ref[...],
                            preferred_element_type=jnp.float32) + b_ref[...])


def run_transformer_block(x, block_params, num_heads):
    B, S, E = x.shape
    kernel = functools.partial(transformer_block_kernel, num_heads)
    in_specs = [pl.BlockSpec((1, S, E), lambda b: (b, 0, 0))]
    in_specs += [_full_spec(p) for p in block_params]
    return pl.pallas_call(
        kernel,
        out_shape=jax.ShapeDtypeStruct((B, S, E), jnp.float32),
        grid=(B,),
        in_specs=in_specs,
        out_specs=pl.BlockSpec((1, S, E), lambda b: (b, 0, 0)),
        compiler_params=pltpu.CompilerParams(
            dimension_semantics=("parallel",),
            vmem_limit_bytes=VMEM_LIMIT_BYTES),
    )(x, *block_params)


def run_linear(x2d, w, b):
    M, E = x2d.shape
    V = w.shape[1]
    tm = _pick_tile(M, (512, 256, 128, 64, 32, 16, 8))
    tv = _pick_tile(V, (512, 256, 128)) if V % 128 == 0 else V
    grid = (M // tm, V // tv)
    return pl.pallas_call(
        linear_kernel,
        out_shape=jax.ShapeDtypeStruct((M, V), jnp.float32),
        grid=grid,
        in_specs=[pl.BlockSpec((tm, E), lambda i, j: (i, 0)),
                  pl.BlockSpec((E, tv), lambda i, j: (0, j)),
                  pl.BlockSpec((1, tv), lambda i, j: (0, j))],
        out_specs=pl.BlockSpec((tm, tv), lambda i, j: (i, j)),
        compiler_params=pltpu.CompilerParams(
            dimension_semantics=("parallel", "parallel"),
            vmem_limit_bytes=VMEM_LIMIT_BYTES),
    )(x2d, w, b)


def init_params(key, emb_size, num_heads, num_layers, ff_hidden_size,
                vocab_size, max_length):
    H = num_heads
    D = emb_size // H
    keys = jax.random.split(key, 2 + num_layers)
    p = {}
    p["embedding"] = 0.02 * jax.random.normal(
        keys[0], (vocab_size, emb_size), jnp.float32)
    # matches nn.Parameter(torch.zeros(1, max_length, emb_size))
    p["pos"] = jnp.zeros((1, max_length, emb_size), jnp.float32)

    def linear_w(k, din, dout):
        return 0.02 * jax.random.normal(k, (din, dout), jnp.float32)

    layers = []
    for l in range(num_layers):
        kq, kk, kv, ko, k1, k2 = jax.random.split(keys[1 + l], 6)
        wq = linear_w(kq, emb_size, emb_size)
        wk = linear_w(kk, emb_size, emb_size)
        wv = linear_w(kv, emb_size, emb_size)
        wo = linear_w(ko, emb_size, emb_size)
        # Fused QKV weight/bias (weights in bf16 for the MXU).
        wqkv = jnp.concatenate([wq, wk, wv], axis=1).astype(jnp.bfloat16)   # (E, 3E)
        bqkv = jnp.zeros((1, 3 * emb_size), jnp.float32)
        # Output projection pre-reshaped to (H, D, E): row index = h*D + d.
        wo3 = wo.reshape(H, D, emb_size).astype(jnp.bfloat16)
        bo = jnp.zeros((1, emb_size), jnp.float32)
        g1 = jnp.ones((1, emb_size), jnp.float32)
        be1 = jnp.zeros((1, emb_size), jnp.float32)
        w1 = linear_w(k1, emb_size, ff_hidden_size).astype(jnp.bfloat16)
        b1 = jnp.zeros((1, ff_hidden_size), jnp.float32)
        w2 = linear_w(k2, ff_hidden_size, emb_size).astype(jnp.bfloat16)
        b2 = jnp.zeros((1, emb_size), jnp.float32)
        g2 = jnp.ones((1, emb_size), jnp.float32)
        be2 = jnp.zeros((1, emb_size), jnp.float32)
        layers.append((wqkv, bqkv, wo3, bo, g1, be1,
                       w1, b1, w2, b2, g2, be2))
    p["layers"] = layers
    kfc = jax.random.fold_in(keys[-1], 12345)
    p["fc_out_w"] = linear_w(kfc, emb_size, vocab_size).astype(jnp.bfloat16)
    p["fc_out_b"] = jnp.zeros((1, vocab_size), jnp.float32)
    return p


def transformer_forward(tokens, params, num_heads):
    B, S = tokens.shape
    # Glue: embedding gather + positional encoding (plain JAX, not a kernel).
    x = jnp.take(params["embedding"], tokens, axis=0) + params["pos"][:, :S, :]
    x = x.astype(jnp.float32)
    for block_params in params["layers"]:
        x = run_transformer_block(x, block_params, num_heads)
    E = x.shape[-1]
    logits = run_linear(x.reshape(B * S, E), params["fc_out_w"], params["fc_out_b"])
    V = params["fc_out_w"].shape[1]
    return logits.reshape(B, S, V)


if __name__ == "__main__":
    # Small configuration consistent with the module.
    emb_size = 32
    num_heads = 4
    num_layers = 2
    ff_hidden_size = 64
    vocab_size = 64
    max_length = 16
    B, S = 2, 8

    key = jax.random.PRNGKey(0)
    kp, kx = jax.random.split(key)
    params = init_params(kp, emb_size, num_heads, num_layers,
                         ff_hidden_size, vocab_size, max_length)
    tokens = jax.random.randint(kx, (B, S), 0, vocab_size, dtype=jnp.int32)

    logits = transformer_forward(tokens, params, num_heads)
    logits = jax.block_until_ready(logits)

    assert logits.shape == (B, S, vocab_size)
    assert bool(jnp.all(jnp.isfinite(logits)))
    print("KERNEL_OK")
</pallas_src>

<mosaic_0001>
module attributes {stable_mosaic.version = 11 : i64} {
  func.func @transformer_block_kernel(%arg0: i32, %arg1: memref<1x8x32xf32, #tpu.memory_space<vmem>>, %arg2: memref<32x96xbf16, #tpu.memory_space<vmem>>, %arg3: memref<1x96xf32, #tpu.memory_space<vmem>>, %arg4: memref<4x8x32xbf16, #tpu.memory_space<vmem>>, %arg5: memref<1x32xf32, #tpu.memory_space<vmem>>, %arg6: memref<1x32xf32, #tpu.memory_space<vmem>>, %arg7: memref<1x32xf32, #tpu.memory_space<vmem>>, %arg8: memref<32x64xbf16, #tpu.memory_space<vmem>>, %arg9: memref<1x64xf32, #tpu.memory_space<vmem>>, %arg10: memref<64x32xbf16, #tpu.memory_space<vmem>>, %arg11: memref<1x32xf32, #tpu.memory_space<vmem>>, %arg12: memref<1x32xf32, #tpu.memory_space<vmem>>, %arg13: memref<1x32xf32, #tpu.memory_space<vmem>>, %arg14: memref<1x8x32xf32, #tpu.memory_space<vmem>>) attributes {dimension_semantics = [#tpu.dimension_semantics<parallel>], iteration_bounds = array<i64: 2>, scalar_prefetch = 0 : i64, scratch_operands = 0 : i64, tpu.core_type = #tpu.core_type<tc>, window_params = [{transform_indices = @transform_0, window_bounds = array<i64: 1, 8, 32>}, {pipeline_mode = #tpu.pipeline_mode<synchronous>, transform_indices = @transform_1, window_bounds = array<i64: 32, 96>}, {pipeline_mode = #tpu.pipeline_mode<synchronous>, transform_indices = @transform_2, window_bounds = array<i64: 1, 96>}, {pipeline_mode = #tpu.pipeline_mode<synchronous>, transform_indices = @transform_3, window_bounds = array<i64: 4, 8, 32>}, {pipeline_mode = #tpu.pipeline_mode<synchronous>, transform_indices = @transform_4, window_bounds = array<i64: 1, 32>}, {pipeline_mode = #tpu.pipeline_mode<synchronous>, transform_indices = @transform_5, window_bounds = array<i64: 1, 32>}, {pipeline_mode = #tpu.pipeline_mode<synchronous>, transform_indices = @transform_6, window_bounds = array<i64: 1, 32>}, {pipeline_mode = #tpu.pipeline_mode<synchronous>, transform_indices = @transform_7, window_bounds = array<i64: 32, 64>}, {pipeline_mode = #tpu.pipeline_mode<synchronous>, transform_indices = @transform_8, window_bounds = array<i64: 1, 64>}, {pipeline_mode = #tpu.pipeline_mode<synchronous>, transform_indices = @transform_9, window_bounds = array<i64: 64, 32>}, {pipeline_mode = #tpu.pipeline_mode<synchronous>, transform_indices = @transform_10, window_bounds = array<i64: 1, 32>}, {pipeline_mode = #tpu.pipeline_mode<synchronous>, transform_indices = @transform_11, window_bounds = array<i64: 1, 32>}, {pipeline_mode = #tpu.pipeline_mode<synchronous>, transform_indices = @transform_12, window_bounds = array<i64: 1, 32>}, {transform_indices = @transform_13, window_bounds = array<i64: 1, 8, 32>}]} {
    %c0 = arith.constant 0 : index
    %c0_0 = arith.constant 0 : index
    %c0_1 = arith.constant 0 : index
    %0 = vector.load %arg1[%c0, %c0_0, %c0_1] : memref<1x8x32xf32, #tpu.memory_space<vmem>>, vector<1x8x32xf32>
    %1 = vector.shape_cast %0 : vector<1x8x32xf32> to vector<8x32xf32>
    %2 = arith.truncf %1 : vector<8x32xf32> to vector<8x32xbf16>
    %c0_2 = arith.constant 0 : index
    %c0_3 = arith.constant 0 : index
    %3 = vector.load %arg2[%c0_2, %c0_3] : memref<32x96xbf16, #tpu.memory_space<vmem>>, vector<32x96xbf16>
    %cst = arith.constant dense<0.000000e+00> : vector<8x96xf32>
    %4 = tpu.matmul %2, %3, %cst {dimension_numbers = #tpu.dot_dimension_numbers<[1], [0], [0], [1], [0, 0, 1, 1], [], []>} : vector<8x32xbf16>, vector<32x96xbf16>, vector<8x96xf32> -> vector<8x96xf32>
    %c0_4 = arith.constant 0 : index
    %c0_5 = arith.constant 0 : index
    %5 = vector.load %arg3[%c0_4, %c0_5] : memref<1x96xf32, #tpu.memory_space<vmem>>, vector<1x96xf32>
    %6 = vector.broadcast %5 : vector<1x96xf32> to vector<8x96xf32>
    %7 = arith.addf %4, %6 : vector<8x96xf32>
    %8 = vector.extract_strided_slice %7 {offsets = [0, 0], sizes = [8, 8], strides = [1, 1]} : vector<8x96xf32> to vector<8x8xf32>
    %9 = vector.extract_strided_slice %7 {offsets = [0, 8], sizes = [8, 8], strides = [1, 1]} : vector<8x96xf32> to vector<8x8xf32>
    %10 = vector.extract_strided_slice %7 {offsets = [0, 16], sizes = [8, 8], strides = [1, 1]} : vector<8x96xf32> to vector<8x8xf32>
    %11 = vector.extract_strided_slice %7 {offsets = [0, 24], sizes = [8, 8], strides = [1, 1]} : vector<8x96xf32> to vector<8x8xf32>
    %12 = vector.shape_cast %8 : vector<8x8xf32> to vector<1x8x8xf32>
    %13 = vector.shape_cast %9 : vector<8x8xf32> to vector<1x8x8xf32>
    %14 = vector.shape_cast %10 : vector<8x8xf32> to vector<1x8x8xf32>
    %15 = vector.shape_cast %11 : vector<8x8xf32> to vector<1x8x8xf32>
    %16 = tpu.concatenate %12, %13, %14, %15 in 0 : vector<1x8x8xf32>, vector<1x8x8xf32>, vector<1x8x8xf32>, vector<1x8x8xf32> -> vector<4x8x8xf32>
    %17 = arith.truncf %16 : vector<4x8x8xf32> to vector<4x8x8xbf16>
    %18 = vector.extract_strided_slice %7 {offsets = [0, 32], sizes = [8, 8], strides = [1, 1]} : vector<8x96xf32> to vector<8x8xf32>
    %19 = vector.extract_strided_slice %7 {offsets = [0, 40], sizes = [8, 8], strides = [1, 1]} : vector<8x96xf32> to vector<8x8xf32>
    %20 = vector.extract_strided_slice %7 {offsets = [0, 48], sizes = [8, 8], strides = [1, 1]} : vector<8x96xf32> to vector<8x8xf32>
    %21 = vector.extract_strided_slice %7 {offsets = [0, 56], sizes = [8, 8], strides = [1, 1]} : vector<8x96xf32> to vector<8x8xf32>
    %22 = vector.shape_cast %18 : vector<8x8xf32> to vector<1x8x8xf32>
    %23 = vector.shape_cast %19 : vector<8x8xf32> to vector<1x8x8xf32>
    %24 = vector.shape_cast %20 : vector<8x8xf32> to vector<1x8x8xf32>
    %25 = vector.shape_cast %21 : vector<8x8xf32> to vector<1x8x8xf32>
    %26 = tpu.concatenate %22, %23, %24, %25 in 0 : vector<1x8x8xf32>, vector<1x8x8xf32>, vector<1x8x8xf32>, vector<1x8x8xf32> -> vector<4x8x8xf32>
    %27 = arith.truncf %26 : vector<4x8x8xf32> to vector<4x8x8xbf16>
    %28 = vector.extract_strided_slice %7 {offsets = [0, 64], sizes = [8, 8], strides = [1, 1]} : vector<8x96xf32> to vector<8x8xf32>
    %29 = vector.extract_strided_slice %7 {offsets = [0, 72], sizes = [8, 8], strides = [1, 1]} : vector<8x96xf32> to vector<8x8xf32>
    %30 = vector.extract_strided_slice %7 {offsets = [0, 80], sizes = [8, 8], strides = [1, 1]} : vector<8x96xf32> to vector<8x8xf32>
    %31 = vector.extract_strided_slice %7 {offsets = [0, 88], sizes = [8, 8], strides = [1, 1]} : vector<8x96xf32> to vector<8x8xf32>
    %32 = vector.shape_cast %28 : vector<8x8xf32> to vector<1x8x8xf32>
    %33 = vector.shape_cast %29 : vector<8x8xf32> to vector<1x8x8xf32>
    %34 = vector.shape_cast %30 : vector<8x8xf32> to vector<1x8x8xf32>
    %35 = vector.shape_cast %31 : vector<8x8xf32> to vector<1x8x8xf32>
    %36 = tpu.concatenate %32, %33, %34, %35 in 0 : vector<1x8x8xf32>, vector<1x8x8xf32>, vector<1x8x8xf32>, vector<1x8x8xf32> -> vector<4x8x8xf32>
    %37 = arith.truncf %36 : vector<4x8x8xf32> to vector<4x8x8xbf16>
    "tpu.trace_start"() <{level = 10 : i32, message = "hqd,hkd->hqk"}> : () -> ()
    %cst_6 = arith.constant dense<0.000000e+00> : vector<4x8x8xf32>
    %38 = tpu.matmul %17, %27, %cst_6 {dimension_numbers = #tpu.dot_dimension_numbers<[2], [2], [1], [1], [0, 0, 0, 1, 1, 1], [0], [0]>} : vector<4x8x8xbf16>, vector<4x8x8xbf16>, vector<4x8x8xf32> -> vector<4x8x8xf32>
    "tpu.trace_stop"() : () -> ()
    %cst_7 = arith.constant 0.353553385 : f32
    %39 = vector.broadcast %cst_7 : f32 to vector<4x8x8xf32>
    %40 = arith.mulf %38, %39 : vector<4x8x8xf32>
    %cst_8 = arith.constant dense<0xFF800000> : vector<4x8xf32>
    %41 = vector.multi_reduction <maximumf>, %40, %cst_8 [2] : vector<4x8x8xf32> to vector<4x8xf32>
    %42 = vector.shape_cast %41 : vector<4x8xf32> to vector<4x8x1xf32>
    %43 = vector.broadcast %42 : vector<4x8x1xf32> to vector<4x8x8xf32>
    %44 = arith.subf %40, %43 : vector<4x8x8xf32>
    %45 = math.exp %44 : vector<4x8x8xf32>
    %cst_9 = arith.constant dense<0.000000e+00> : vector<4x8xf32>
    %46 = vector.multi_reduction <add>, %45, %cst_9 [2] : vector<4x8x8xf32> to vector<4x8xf32>
    %47 = vector.shape_cast %46 : vector<4x8xf32> to vector<4x8x1xf32>
    %48 = tpu.reciprocal %47 {approx = true} : vector<4x8x1xf32> -> vector<4x8x1xf32>
    %49 = vector.broadcast %48 : vector<4x8x1xf32> to vector<4x8x8xf32>
    %50 = arith.mulf %45, %49 : vector<4x8x8xf32>
    %51 = arith.truncf %50 : vector<4x8x8xf32> to vector<4x8x8xbf16>
    "tpu.trace_start"() <{level = 10 : i32, message = "hqk,hkd->hqd"}> : () -> ()
    %cst_10 = arith.constant dense<0.000000e+00> : vector<4x8x8xf32>
    %52 = tpu.matmul %51, %37, %cst_10 {dimension_numbers = #tpu.dot_dimension_numbers<[2], [1], [1], [2], [0, 0, 0, 1, 1, 2], [0], [0]>} : vector<4x8x8xbf16>, vector<4x8x8xbf16>, vector<4x8x8xf32> -> vector<4x8x8xf32>
    "tpu.trace_stop"() : () -> ()
    %53 = arith.truncf %52 : vector<4x8x8xf32> to vector<4x8x8xbf16>
    %c0_11 = arith.constant 0 : index
    %c0_12 = arith.constant 0 : index
    %c0_13 = arith.constant 0 : index
    %54 = vector.load %arg4[%c0_11, %c0_12, %c0_13] : memref<4x8x32xbf16, #tpu.memory_space<vmem>>, vector<4x8x32xbf16>
    "tpu.trace_start"() <{level = 10 : i32, message = "hsd,hde->hse"}> : () -> ()
    %cst_14 = arith.constant dense<0.000000e+00> : vector<4x8x32xf32>
    %55 = tpu.matmul %53, %54, %cst_14 {dimension_numbers = #tpu.dot_dimension_numbers<[2], [1], [1], [2], [0, 0, 0, 1, 1, 2], [0], [0]>} : vector<4x8x8xbf16>, vector<4x8x32xbf16>, vector<4x8x32xf32> -> vector<4x8x32xf32>
    "tpu.trace_stop"() : () -> ()
    %cst_15 = arith.constant dense<0.000000e+00> : vector<8x32xf32>
    %56 = vector.multi_reduction <add>, %55, %cst_15 [0] : vector<4x8x32xf32> to vector<8x32xf32>
    %c0_16 = arith.constant 0 : index
    %c0_17 = arith.constant 0 : index
    %57 = vector.load %arg5[%c0_16, %c0_17] : memref<1x32xf32, #tpu.memory_space<vmem>>, vector<1x32xf32>
    %58 = vector.broadcast %57 : vector<1x32xf32> to vector<8x32xf32>
    %59 = arith.addf %56, %58 : vector<8x32xf32>
    %60 = arith.addf %59, %1 : vector<8x32xf32>
    %c0_18 = arith.constant 0 : index
    %c0_19 = arith.constant 0 : index
    %61 = vector.load %arg6[%c0_18, %c0_19] : memref<1x32xf32, #tpu.memory_space<vmem>>, vector<1x32xf32>
    %c0_20 = arith.constant 0 : index
    %c0_21 = arith.constant 0 : index
    %62 = vector.load %arg7[%c0_20, %c0_21] : memref<1x32xf32, #tpu.memory_space<vmem>>, vector<1x32xf32>
    %cst_22 = arith.constant dense<0.000000e+00> : vector<8xf32>
    %63 = vector.multi_reduction <add>, %60, %cst_22 [1] : vector<8x32xf32> to vector<8xf32>
    %64 = vector.shape_cast %63 : vector<8xf32> to vector<8x1xf32>
    %cst_23 = arith.constant 3.200000e+01 : f32
    %65 = vector.broadcast %cst_23 : f32 to vector<8x1xf32>
    %66 = arith.divf %64, %65 : vector<8x1xf32>
    %67 = vector.broadcast %66 : vector<8x1xf32> to vector<8x32xf32>
    %68 = arith.subf %60, %67 : vector<8x32xf32>
    %69 = arith.mulf %68, %68 : vector<8x32xf32>
    %cst_24 = arith.constant dense<0.000000e+00> : vector<8xf32>
    %70 = vector.multi_reduction <add>, %69, %cst_24 [1] : vector<8x32xf32> to vector<8xf32>
    %71 = vector.shape_cast %70 : vector<8xf32> to vector<8x1xf32>
    %cst_25 = arith.constant 3.200000e+01 : f32
    %72 = vector.broadcast %cst_25 : f32 to vector<8x1xf32>
    %73 = arith.divf %71, %72 : vector<8x1xf32>
    %74 = vector.broadcast %66 : vector<8x1xf32> to vector<8x32xf32>
    %75 = arith.subf %60, %74 : vector<8x32xf32>
    %cst_26 = arith.constant 9.99999974E-6 : f32
    %76 = vector.broadcast %cst_26 : f32 to vector<8x1xf32>
    %77 = arith.addf %73, %76 : vector<8x1xf32>
    %78 = math.rsqrt %77 : vector<8x1xf32>
    %79 = vector.broadcast %78 : vector<8x1xf32> to vector<8x32xf32>
    %80 = arith.mulf %75, %79 : vector<8x32xf32>
    %81 = vector.broadcast %61 : vector<1x32xf32> to vector<8x32xf32>
    %82 = arith.mulf %80, %81 : vector<8x32xf32>
    %83 = vector.broadcast %62 : vector<1x32xf32> to vector<8x32xf32>
    %84 = arith.addf %82, %83 : vector<8x32xf32>
    %85 = arith.truncf %84 : vector<8x32xf32> to vector<8x32xbf16>
    %c0_27 = arith.constant 0 : index
    %c0_28 = arith.constant 0 : index
    %86 = vector.load %arg8[%c0_27, %c0_28] : memref<32x64xbf16, #tpu.memory_space<vmem>>, vector<32x64xbf16>
    %cst_29 = arith.constant dense<0.000000e+00> : vector<8x64xf32>
    %87 = tpu.matmul %85, %86, %cst_29 {dimension_numbers = #tpu.dot_dimension_numbers<[1], [0], [0], [1], [0, 0, 1, 1], [], []>} : vector<8x32xbf16>, vector<32x64xbf16>, vector<8x64xf32> -> vector<8x64xf32>
    %c0_30 = arith.constant 0 : index
    %c0_31 = arith.constant 0 : index
    %88 = vector.load %arg9[%c0_30, %c0_31] : memref<1x64xf32, #tpu.memory_space<vmem>>, vector<1x64xf32>
    %89 = vector.broadcast %88 : vector<1x64xf32> to vector<8x64xf32>
    %90 = arith.addf %87, %89 : vector<8x64xf32>
    %cst_32 = arith.constant 0.000000e+00 : f32
    %91 = vector.broadcast %cst_32 : f32 to vector<8x64xf32>
    %92 = arith.maximumf %90, %91 : vector<8x64xf32>
    %93 = arith.truncf %92 : vector<8x64xf32> to vector<8x64xbf16>
    %c0_33 = arith.constant 0 : index
    %c0_34 = arith.constant 0 : index
    %94 = vector.load %arg10[%c0_33, %c0_34] : memref<64x32xbf16, #tpu.memory_space<vmem>>, vector<64x32xbf16>
    %cst_35 = arith.constant dense<0.000000e+00> : vector<8x32xf32>
    %95 = tpu.matmul %93, %94, %cst_35 {dimension_numbers = #tpu.dot_dimension_numbers<[1], [0], [0], [1], [0, 0, 1, 1], [], []>} : vector<8x64xbf16>, vector<64x32xbf16>, vector<8x32xf32> -> vector<8x32xf32>
    %c0_36 = arith.constant 0 : index
    %c0_37 = arith.constant 0 : index
    %96 = vector.load %arg11[%c0_36, %c0_37] : memref<1x32xf32, #tpu.memory_space<vmem>>, vector<1x32xf32>
    %97 = vector.broadcast %96 : vector<1x32xf32> to vector<8x32xf32>
    %98 = arith.addf %95, %97 : vector<8x32xf32>
    %99 = arith.addf %98, %84 : vector<8x32xf32>
    %c0_38 = arith.constant 0 : index
    %c0_39 = arith.constant 0 : index
    %100 = vector.load %arg12[%c0_38, %c0_39] : memref<1x32xf32, #tpu.memory_space<vmem>>, vector<1x32xf32>
    %c0_40 = arith.constant 0 : index
    %c0_41 = arith.constant 0 : index
    %101 = vector.load %arg13[%c0_40, %c0_41] : memref<1x32xf32, #tpu.memory_space<vmem>>, vector<1x32xf32>
    %cst_42 = arith.constant dense<0.000000e+00> : vector<8xf32>
    %102 = vector.multi_reduction <add>, %99, %cst_42 [1] : vector<8x32xf32> to vector<8xf32>
    %103 = vector.shape_cast %102 : vector<8xf32> to vector<8x1xf32>
    %cst_43 = arith.constant 3.200000e+01 : f32
    %104 = vector.broadcast %cst_43 : f32 to vector<8x1xf32>
    %105 = arith.divf %103, %104 : vector<8x1xf32>
    %106 = vector.broadcast %105 : vector<8x1xf32> to vector<8x32xf32>
    %107 = arith.subf %99, %106 : vector<8x32xf32>
    %108 = arith.mulf %107, %107 : vector<8x32xf32>
    %cst_44 = arith.constant dense<0.000000e+00> : vector<8xf32>
    %109 = vector.multi_reduction <add>, %108, %cst_44 [1] : vector<8x32xf32> to vector<8xf32>
    %110 = vector.shape_cast %109 : vector<8xf32> to vector<8x1xf32>
    %cst_45 = arith.constant 3.200000e+01 : f32
    %111 = vector.broadcast %cst_45 : f32 to vector<8x1xf32>
    %112 = arith.divf %110, %111 : vector<8x1xf32>
    %113 = vector.broadcast %105 : vector<8x1xf32> to vector<8x32xf32>
    %114 = arith.subf %99, %113 : vector<8x32xf32>
    %cst_46 = arith.constant 9.99999974E-6 : f32
    %115 = vector.broadcast %cst_46 : f32 to vector<8x1xf32>
    %116 = arith.addf %112, %115 : vector<8x1xf32>
    %117 = math.rsqrt %116 : vector<8x1xf32>
    %118 = vector.broadcast %117 : vector<8x1xf32> to vector<8x32xf32>
    %119 = arith.mulf %114, %118 : vector<8x32xf32>
    %120 = vector.broadcast %100 : vector<1x32xf32> to vector<8x32xf32>
    %121 = arith.mulf %119, %120 : vector<8x32xf32>
    %122 = vector.broadcast %101 : vector<1x32xf32> to vector<8x32xf32>
    %123 = arith.addf %121, %122 : vector<8x32xf32>
    %c0_47 = arith.constant 0 : index
    %c0_48 = arith.constant 0 : index
    %c0_49 = arith.constant 0 : index
    %124 = vector.load %arg14[%c0_47, %c0_48, %c0_49] : memref<1x8x32xf32, #tpu.memory_space<vmem>>, vector<1x8x32xf32>
    %125 = vector.shape_cast %124 : vector<1x8x32xf32> to vector<8x32xf32>
    %126 = vector.shape_cast %123 : vector<8x32xf32> to vector<1x8x32xf32>
    tpu.vector_store %arg14[%c0_47, %c0_48, %c0_49], %126 {strides = array<i32>} : memref<1x8x32xf32, #tpu.memory_space<vmem>>, vector<1x8x32xf32>,
    return
  }
  func.func @transform_0(%arg0: i32) -> (i32, i32, i32) {
    %c0_i32 = arith.constant 0 : i32
    %c0_i32_0 = arith.constant 0 : i32
    %c0_i32_1 = arith.constant 0 : i32
    return %arg0, %c0_i32, %c0_i32_0 : i32, i32, i32
  }
  func.func @transform_1(%arg0: i32) -> (i32, i32) {
    %c0_i32 = arith.constant 0 : i32
    %c0_i32_0 = arith.constant 0 : i32
    %c0_i32_1 = arith.constant 0 : i32
    return %c0_i32, %c0_i32_0 : i32, i32
  }
  func.func @transform_2(%arg0: i32) -> (i32, i32) {
    %c0_i32 = arith.constant 0 : i32
    %c0_i32_0 = arith.constant 0 : i32
    %c0_i32_1 = arith.constant 0 : i32
    return %c0_i32, %c0_i32_0 : i32, i32
  }
  func.func @transform_3(%arg0: i32) -> (i32, i32, i32) {
    %c0_i32 = arith.constant 0 : i32
    %c0_i32_0 = arith.constant 0 : i32
    %c0_i32_1 = arith.constant 0 : i32
    %c0_i32_2 = arith.constant 0 : i32
    return %c0_i32, %c0_i32_0, %c0_i32_1 : i32, i32, i32
  }
  func.func @transform_4(%arg0: i32) -> (i32, i32) {
    %c0_i32 = arith.constant 0 : i32
    %c0_i32_0 = arith.constant 0 : i32
    %c0_i32_1 = arith.constant 0 : i32
    return %c0_i32, %c0_i32_0 : i32, i32
  }
  func.func @transform_5(%arg0: i32) -> (i32, i32) {
    %c0_i32 = arith.constant 0 : i32
    %c0_i32_0 = arith.constant 0 : i32
    %c0_i32_1 = arith.constant 0 : i32
    return %c0_i32, %c0_i32_0 : i32, i32
  }
  func.func @transform_6(%arg0: i32) -> (i32, i32) {
    %c0_i32 = arith.constant 0 : i32
    %c0_i32_0 = arith.constant 0 : i32
    %c0_i32_1 = arith.constant 0 : i32
    return %c0_i32, %c0_i32_0 : i32, i32
  }
  func.func @transform_7(%arg0: i32) -> (i32, i32) {
    %c0_i32 = arith.constant 0 : i32
    %c0_i32_0 = arith.constant 0 : i32
    %c0_i32_1 = arith.constant 0 : i32
    return %c0_i32, %c0_i32_0 : i32, i32
  }
  func.func @transform_8(%arg0: i32) -> (i32, i32) {
    %c0_i32 = arith.constant 0 : i32
    %c0_i32_0 = arith.constant 0 : i32
    %c0_i32_1 = arith.constant 0 : i32
    return %c0_i32, %c0_i32_0 : i32, i32
  }
  func.func @transform_9(%arg0: i32) -> (i32, i32) {
    %c0_i32 = arith.constant 0 : i32
    %c0_i32_0 = arith.constant 0 : i32
    %c0_i32_1 = arith.constant 0 : i32
    return %c0_i32, %c0_i32_0 : i32, i32
  }
  func.func @transform_10(%arg0: i32) -> (i32, i32) {
    %c0_i32 = arith.constant 0 : i32
    %c0_i32_0 = arith.constant 0 : i32
    %c0_i32_1 = arith.constant 0 : i32
    return %c0_i32, %c0_i32_0 : i32, i32
  }
  func.func @transform_11(%arg0: i32) -> (i32, i32) {
    %c0_i32 = arith.constant 0 : i32
    %c0_i32_0 = arith.constant 0 : i32
    %c0_i32_1 = arith.constant 0 : i32
    return %c0_i32, %c0_i32_0 : i32, i32
  }
  func.func @transform_12(%arg0: i32) -> (i32, i32) {
    %c0_i32 = arith.constant 0 : i32
    %c0_i32_0 = arith.constant 0 : i32
    %c0_i32_1 = arith.constant 0 : i32
    return %c0_i32, %c0_i32_0 : i32, i32
  }
  func.func @transform_13(%arg0: i32) -> (i32, i32, i32) {
    %c0_i32 = arith.constant 0 : i32
    %c0_i32_0 = arith.constant 0 : i32
    %c0_i32_1 = arith.constant 0 : i32
    return %arg0, %c0_i32, %c0_i32_0 : i32, i32, i32
  }
}

</mosaic_0001>

<bundles_post_ra>
// kernel: tpu_custom_call.1
= control target key start
LH: loop header
LB: loop body
LE: loop exit
PB: predicated region body
PF: predicated region fallthrough
CT: control target
= control target key end

     0   :  { %s2231_s0 = inlined_call_operand.vmem [shape: f32[2,8,32], index: 0, kind: input, shape index: {}]   ;;  %s2232_s1 = inlined_call_operand.vmem [shape: bf16[32,96], index: 1, kind: input, shape index: {}]   ;;  %s2233_s2 = inlined_call_operand.vmem [shape: f32[1,96], index: 2, kind: input, shape index: {}]   ;;  %s2234_s3 = inlined_call_operand.vmem [shape: bf16[4,8,32], index: 3, kind: input, shape index: {}]   ;;  %s2235_s4 = inlined_call_operand.vmem [shape: f32[1,32], index: 4, kind: input, shape index: {}]   ;;  %s2236_s5 = inlined_call_operand.vmem [shape: f32[1,32], index: 5, kind: input, shape index: {}]   ;;  %s2237_s6 = inlined_call_operand.vmem [shape: f32[1,32], index: 6, kind: input, shape index: {}]   ;;  %s2238_s7 = inlined_call_operand.hbm [shape: bf16[32,64], index: 7, kind: input, shape index: {}]   ;;  %s2239_s8 = inlined_call_operand.vmem [shape: f32[1,64], index: 8, kind: input, shape index: {}]   ;;  %s2240_s9 = inlined_call_operand.vmem [shape: bf16[64,32], index: 9, kind: input, shape index: {}]   ;;  %s2241_s10 = inlined_call_operand.vmem [shape: f32[1,32], index: 10, kind: input, shape index: {}]   ;;  %s2242_s11 = inlined_call_operand.vmem [shape: f32[1,32], index: 11, kind: input, shape index: {}]   ;;  %s2243_s12 = inlined_call_operand.vmem [shape: f32[1,32], index: 12, kind: input, shape index: {}]   ;;  %s2244_s13 = inlined_call_operand.hbm [shape: f32[2,8,32], index: 13, kind: output, shape index: {}]  }
   0x1   :  { %2251 = sst [smem:[#allocation11_spill]] %s2231_s0 }
   0x2   :  { %18 = vsyncpa [#allocation3], 0 }
   0x3   :  { %19 = vsyncpa [#allocation4], 0 }
   0x4   :  { %21 = vsyncpa [#allocation4 + $0x1], 0  ;;  %s1925_s25 = smov 0   ;;  %s1927_s26 = smov 0  }
   0x5   :  { %s1929_s27 = smov 0   ;;  %s1931_s28 = smov 0  }
   0x6 LB: > { %2252 = sst [smem:[#allocation8_spill]] %s1838_s27  ;;  %s1946_s29 = sadd.s32 4294967295, %s1842_s28   ;;  %s1842_s28 = sphi %s1931_s28, %s2265_s28   ;;  %s1838_s27 = sphi %s1929_s27, %s2267_s27   ;;  %s1834_s26 = sphi %s1927_s26, %s2269_s26   ;;  %s1830_s25 = sphi %s1925_s25, %s2268_s25  }
   0x7   : > { %s1483_s30 = sadd.s32 4294967294, %s1842_s28   ;;  %s1950_s14 = sadd.s32 1, %s1842_s28  }
   0x8   : > { %2253 = sst [smem:[#allocation9_spill]] %s1950_s14  ;;  %s312_s15 = sadd.s32 1, %s1838_s27 }
   0x9   : > { %s309_s16 = ssub.s32 %s1842_s28, %s1950_s14  ;;  %p322_p0 = scmp.ne.s32.totalorder %s1838_s27, %s1834_s26 }
   0xa   : > { %p310_p1 = scmp.eq.s32.totalorder %s309_s16, 0  ;;  %p323_p2 = scmp.eq.s32.totalorder %s1946_s29, 1 }
   0xb   : > { %p328_p3 = scmp.ne.s32.totalorder %s1834_s26, %s1830_s25  ;;  %p329_p4 = scmp.eq.s32.totalorder %s1483_s30, 1 }
   0xc   : > { %s1961_s17 = scalar_select %p310_p1, %s1838_s27, %s312_s15  }
   0xd   : > { %p1963_p5 = por %p323_p2, %p322_p0  ;;  %p1967_p6 = por %p329_p4, %p328_p3 }
   0xe   : > { %2254 = sst [smem:[#allocation10_spill]] %s1961_s17  ;;  %p1484_p7 = scmp.ge.s32.totalorder %s1842_s28, 1 }
   0xf   : > { %s2255_s18 = scalar_select %p1963_p5, 1, 0 }
  0x10   : > { %s2256_s19 = scalar_select %p1967_p6, 1, 0 }
  0x11   : > { %p336_p8 = scmp.lt.s32.totalorder %s1842_s28, 3  ;;  %p2248_p9 = scmp.eq.s32.totalorder %s1946_s29, 0 }
  0x12   : > { %s1844_s21 = smov [#allocation2]   ;;  %s1748_s15 = scalar_lea.hbm %s2238_s7, 256 }
  0x13   : > { %p1974_p10 = pnand %p1484_p7, %p336_p8  ;;  %s366_s22 = sshll.u32 %s1844_s21, 4  ;;  %s367_s22 = int_to_ptr.vmem [resolvable:$true] %s366_s22 }
  0x14   : > { %p1749_p13 = scmp.ne.s32.totalorder %s2238_s7, %s1748_s15  ;;  %p1755_p3 = scmp.lt.u32.totalorder %s1748_s15, %s2238_s7 }
  0x15   : > { %s2257_s20 = scalar_select %p1974_p10, 1, 0 }
  0x16   : > { %p1667_p11 = pneg %p1974_p10 }
  0x18   : > { %p1982_p12 = pnand %p2248_p9, %p1667_p11 }
  0x1a   : > { %p1750_p0 = pneg %p1982_p12 }
  0x1c   : > { %p1751_p1 = pnand %p1750_p0, %p1749_p13 }
  0x1e   : > { %p1752_p2 = pneg %p1751_p1 }
  0x20   : > { %p1757_p4 = pnand %p1755_p3, %p1752_p2 }
  0x22   : > { %1760 = shalt.err (!%p1757_p4)
}
  0x23   : > { %s1761_s14 = scalar_lea.vmem %s367_s22, 256  ;;  %p1769_p9 = scmp.lt.s32.totalorder %s367_s22, %s367_s22 }
  0x24   : > { %p1762_p7 = scmp.ne.s32.totalorder %s367_s22, %s1761_s14  ;;  %p1770_p6 = scmp.lt.s32.totalorder %s1761_s14, %s1761_s14 }
  0x26   : > { %p1764_p8 = pnand %p1762_p7, %p1750_p0  ;;  %p1771_p5 = por %p1770_p6, %p1769_p9 }
  0x28   : > { %p1765_p11 = pneg %p1764_p8 }
  0x2a   : > { %p1772_p10 = pnand %p1771_p5, %p1765_p11 }
  0x2c   : > { %1775 = shalt.err (!%p1772_p10)
}
  0x2d   : > { %s1845_s17 = smov 64   ;;  %s1846_s24 = smov 4  }
  0x2e   : > { %1670 = dma.hbm_to_vmem [thread:$0]  (!%p1982_p12), %s2238_s7, 256, %s367_s22, [#allocation3], %s1845_s17, %s1845_s17, %s1846_s24  }
  0x2f   : > { %p2259_p13 = scmp.ne.s32.totalorder %s2257_s20, 0 }
  0x30   : > { %p2260_p1 = scmp.eq.s32.totalorder (!%p2259_p13), %s1946_s29, 0 }
  0x31   : > { %404 = sbr.rel (%p2259_p13) target bundleno = 2568 (0xa08), region = 72 }
  0x38   : > { %1821 = dma.done.wait (%p2260_p1), [#allocation3], 256   ;;  %p2261_p0 = pmov %p2260_p1 }
  0x39   : > { %p447_p5 = scmp.lt.s32.totalorder %s1946_s29, 1  ;;  %v1847_v0 = vmov 0.0   ;;  %vm1848_vm0 = vmmov 0   ;;  %s2262_s0 = sld [smem:[#allocation11_spill]]  ;;  %v1720_v1 = vld [vmem:[%s2232_s1] sm:$0xff]   ;;  %v1721_v2 = vld [vmem:[%s2232_s1 + $0x8] sm:$0xff]  }
  0x3a   : > { %1823 = vsyncadd (%p2261_p0), [#allocation3], 4294967040  ;;  %1561 = vmatprep.subr.bf16.mxu1 %v1847_v0  ;;  %1565 = vmatprep.mubr.msk.bf16.mxu1 %vm1848_vm0, %v1847_v0  ;;  %vm477_vm1 = vcmask 261120   ;;  %v1491_v5 = vld [vmem:[%s2233_s2] ss:$0 sm:$0xff]  ;;  %s1851_s20 = smov 112  }
  0x3b   : > { %s448_s27 = scalar_select %p447_p5, %s1946_s29, 1  ;;  %1575 = vmatprep.subr.bf16.mxu0 %v1847_v0  ;;  %1577 = vmatprep.mubr.msk.bf16.mxu0 %vm1848_vm0, %v1847_v0  ;;  %vm538_vm2 = vcmask 64512   ;;  %vm789_vm3 = vcmask 1043456   ;;  %vm1323_vm4 = vcmask 523264  }
  0x3c   : > { %1562 = vmatpush3.bf16.msra.mxu1 %v1720_v1  ;;  %s1852_s22 = smov 96   ;;  %s444_s30 = sand.u32 1, %s1834_s26  }
  0x3d   : > { %s1490_s14 = sshll.u32 %s448_s27, 3  ;;  %1563 = vmatprep.subr.bf16.mxu1 %v1847_v0  ;;  %s1849_s27 = smov 104  }
  0x3e   : > { %s1489_s16 = sshll.u32 %s444_s30, 3  ;;  %p2263_p9 = scmp.ne.s32.totalorder %s2255_s18, 0 }
  0x3f   : > { %s450_s23 = scalar_lea.vmem %s2262_s0, %s1490_s14  ;;  %s1850_s14 = smov 120  }
  0x40   : > { %v2025_v3 = vld [vmem:[%s450_s23] sm:$0xff]  ;;  %1564 = vmatpush3.bf16.msra.mxu1 %v1721_v2  ;;  %s1853_s23 = smov 64   ;;  %s446_s15 = scalar_lea.vmem [#allocation5], %s1489_s16 }
  0x41   : > { %v453_v4 = vpack.c.bf16 %v2025_v3, %v2025_v3  ;;  %1569 = vmatprep.subr.bf16.mxu1 %v1847_v0  ;;  %s1412_s21 = sshll.u32 %s446_s15, 4  ;;  %s2190_s21 = int_to_ptr.vmem [resolvable:$true] %s1412_s21 }
  0x43   : > { %1566 = vmatmul.mubr.msk.bf16.vlgmr.msra.gmra.mrb[0].mxu1 %vm477_vm1, %v453_v4 }
  0x44   : > { %1571 = vmatprep.mubr.msk.bf16.mxu1 %vm1848_vm0, %v1847_v0 }
 0x116   : > { %v515_v6 = vpop.f32.mrb[0].mxu1 }
 0x117   : > { %v516_v7 = vadd.f32 %v1491_v5, %v515_v6  ;;  %v1567_v8 = vpop.f32.mrb[1].mxu1 }
 0x118   : > { %v518_v9 = vpop.f32.mrb[2].mxu1 }
 0x119   : > { %528 = vrot.lane.b32.xlu1 %v516_v7, %s1849_s27  ;;  %522 = vrot.lane.b32.xlu0 %v516_v7, %s1850_s14  ;;  %v1568_v10 = vpop.f32.mrb[3].mxu1  ;;  %v2037_v11 = vpack.c.bf16 %v516_v7, %v516_v7  ;;  %s1399_s27 = scalar_lea.sflag [#allocation4], %s444_s30  ;;  %s1776_s14 = scalar_lea.vmem %s2190_s21, 128 }
 0x11a   : > { %p1777_p6 = scmp.ne.s32.totalorder %s2190_s21, %s1776_s14 }
 0x11c   : > { %p1778_p10 = pnand %p1777_p6, %p2263_p9 }
 0x11d   : > { %525 = vrot.lane.b32.xlu0 %v516_v7, %s1851_s20  ;;  %536 = vrot.lane.b32.xlu1 %v2037_v11, %s1852_s22 }
 0x11e   : > { %p1779_p12 = pneg %p1778_p10 }
 0x18b   : > { %v529_v12 = vpop.permute.xlu1 %528  ;;  %v523_v13 = vpop.permute.xlu0 %522 }
 0x18c   : > { %v532_v14 = vpack.c.bf16 %v523_v13, %v523_v13  ;;  %v2040_v17 = vpack.c.bf16 %v529_v12, %v529_v12 }
 0x18e   : > { %586 = vrot.lane.b32.xlu0 %v532_v14, %s1852_s22 }
 0x18f   : > { %v526_v15 = vpop.permute.xlu0 %525  ;;  %v537_v16 = vpop.permute.xlu1 %536 }
 0x190   : > { %v2042_v18 = vpack.c.bf16 %v526_v15, %v526_v15  ;;  %v543_v19 = vsel %vm538_vm2, %v537_v16, 0 }
 0x191   : > { %1570 = vmatpush3.bf16.xpose.msra.mxu1 %v543_v19 }
 0x192   : > { %684 = vrot.lane.b32.xlu0 %v2040_v17, %s1852_s22  ;;  %635 = vrot.lane.b32.xlu1 %v2042_v18, %s1852_s22 }
 0x193   : > { %1581 = vmatprep.subr.bf16.mxu1 %v1847_v0 }
 0x198   : > { %1572 = vmatmul.mubr.msk.bf16.vlgmr.msra.gmra.mrb[4].mxu1 %vm538_vm2, %v2037_v11 }
 0x199   : > { %1583 = vmatprep.mubr.msk.bf16.mxu1 %vm1848_vm0, %v1847_v0 }
 0x200   : > { %v587_v20 = vpop.permute.xlu0 %586 }
 0x201   : > { %v592_v21 = vsel %vm538_vm2, %v587_v20, 0 }
 0x202   : > { %1576 = vmatpush3.bf16.xpose.msra.mxu0 %v592_v21 }
 0x203   : > { %1587 = vmatprep.subr.bf16.mxu0 %v1847_v0 }
 0x204   : > { %v636_v22 = vpop.permute.xlu1 %635  ;;  %v685_v24 = vpop.permute.xlu0 %684 }
 0x205   : > { %v641_v23 = vsel %vm538_vm2, %v636_v22, 0  ;;  %v690_v25 = vsel %vm538_vm2, %v685_v24, 0 }
 0x206   : > { %1582 = vmatpush3.bf16.xpose.msra.mxu1 %v641_v23 }
 0x207   : > { %1593 = vmatprep.subr.bf16.mxu1 %v1847_v0 }
 0x209   : > { %1578 = vmatmul.mubr.msk.bf16.vlgmr.msra.gmra.mrb[0].mxu0 %vm538_vm2, %v532_v14 }
 0x20a   : > { %1588 = vmatpush3.bf16.xpose.msra.mxu0 %v690_v25  ;;  %1589 = vmatprep.mubr.msk.bf16.mxu0 %vm1848_vm0, %v1847_v0 }
 0x20b   : > { %1599 = vmatprep.subr.bf16.mxu0 %v1847_v0 }
 0x20d   : > { %1584 = vmatmul.mubr.msk.bf16.vlgmr.msra.gmra.mrb[8].mxu1 %vm538_vm2, %v2042_v18 }
 0x20e   : > { %1595 = vmatprep.mubr.msk.bf16.mxu1 %vm1848_vm0, %v1847_v0 }
 0x211   : > { %1590 = vmatmul.mubr.msk.bf16.vlgmr.msra.gmra.mrb[4].mxu0 %vm538_vm2, %v2040_v17 }
 0x212   : > { %1601 = vmatprep.mubr.msk.bf16.mxu0 %vm1848_vm0, %v1847_v0 }
 0x26b   : > { %v579_v26 = vpop.f32.mrb[4].mxu1 }
 0x26c   : > { %v732_v27 = vmul.f32 0.35355338, %v579_v26  ;;  %v1573_v28 = vpop.f32.mrb[5].mxu1  ;;  %v981_v26 = vld [vmem:[%s2234_s3] sm:$0xf] }
 0x26d   : > { %v582_v29 = vpop.f32.mrb[6].mxu1 }
 0x26e   : > { %v1574_v30 = vpop.f32.mrb[7].mxu1  ;;  %v736_v31 = vsel %vm538_vm2, %v732_v27, -inf }
 0x26f   : > { %737 = vmax.xlane.f32.xlu1 %v736_v31  ;;  %v989_v30 = vsel %vm789_vm3, %v981_v26, 0 }
 0x2dc   : > { %v628_v32 = vpop.f32.mrb[0].mxu0 }
 0x2dd   : > { %v733_v33 = vmul.f32 0.35355338, %v628_v32  ;;  %v1579_v34 = vpop.f32.mrb[1].mxu0  ;;  %v982_v32 = vld [vmem:[%s2234_s3 + $0x4] sm:$0xf] }
 0x2de   : > { %v631_v35 = vpop.f32.mrb[2].mxu0 }
 0x2df   : > { %v1580_v36 = vpop.f32.mrb[3].mxu0  ;;  %v739_v37 = vsel %vm538_vm2, %v733_v33, -inf  ;;  %v1035_v35 = vsel %vm789_vm3, %v982_v32, 0  ;;  %v1725_v32 = vld [vmem:[%s2240_s9 + $0x8] sm:$0xff]  }
 0x2e0   : > { %740 = vmax.xlane.f32.xlu0 %v739_v37  ;;  %v677_v38 = vpop.f32.mrb[8].mxu1  ;;  %v983_v36 = vld [vmem:[%s2234_s3 + $0x8] sm:$0xf] }
 0x2e1   : > { %v734_v39 = vmul.f32 0.35355338, %v677_v38  ;;  %v1585_v40 = vpop.f32.mrb[9].mxu1 }
 0x2e2   : > { %v680_v41 = vpop.f32.mrb[10].mxu1  ;;  %v1081_v40 = vsel %vm789_vm3, %v983_v36, 0 }
 0x2e3   : > { %v1586_v42 = vpop.f32.mrb[11].mxu1  ;;  %v742_v43 = vsel %vm538_vm2, %v734_v39, -inf }
 0x2e4   : > { %v726_v44 = vpop.f32.mrb[4].mxu0  ;;  %743 = vmax.xlane.f32.xlu0 %v742_v43  ;;  %v984_v43 = vld [vmem:[%s2234_s3 + $0xc] sm:$0xf] }
 0x2e5   : > { %v735_v45 = vmul.f32 0.35355338, %v726_v44  ;;  %v1591_v46 = vpop.f32.mrb[5].mxu0 }
 0x2e6   : > { %v729_v47 = vpop.f32.mrb[6].mxu0 }
 0x2e7   : > { %v1592_v48 = vpop.f32.mrb[7].mxu0  ;;  %v745_v49 = vsel %vm538_vm2, %v735_v45, -inf  ;;  %v1127_v47 = vsel %vm789_vm3, %v984_v43, 0  ;;  %v1726_v43 = vld [vmem:[%s2240_s9 + $0x10] sm:$0xff]  }
 0x2e8   : > { %746 = vmax.xlane.f32.xlu1 %v745_v49 }
 0x2f9   : > { %833 = vrot.lane.b32.xlu1 %v532_v14, %s1853_s23 }
 0x2fa   : > { %784 = vrot.lane.b32.xlu0 %v2037_v11, %s1853_s23 }
 0x2fc   : > { %v738_v50 = vpop.xlane.xlu1 %737 }
 0x2fd   : > { %v748_v51 = vsub.f32 %v732_v27, %v738_v50 }
 0x2ff   : > { %v752_v52 = vmul.f32 1.442695, %v748_v51 }
 0x301   : > { %1728 = vpow2.f32 %v752_v52 }
 0x30b   : > { %v1729_v53 = vpop.eup %1728 }
 0x30c   : > { %v760_v54 = vsel %vm538_vm2, %v1729_v53, 0.0 }
 0x319   : > { %761 = vadd.xlane.f32.xlu0 %v760_v54 }
 0x36d   : > { %v741_v55 = vpop.xlane.xlu0 %740 }
 0x36e   : > { %v749_v56 = vsub.f32 %v733_v33, %v741_v55 }
 0x370   : > { %v754_v57 = vmul.f32 1.442695, %v749_v56 }
 0x371   : > { %v744_v58 = vpop.xlane.xlu0 %743 }
 0x372   : > { %1730 = vpow2.f32 %v754_v57  ;;  %v750_v59 = vsub.f32 %v734_v39, %v744_v58 }
 0x374   : > { %v756_v60 = vmul.f32 1.442695, %v750_v59 }
 0x375   : > { %v747_v61 = vpop.xlane.xlu1 %746  ;;  %v785_v62 = vpop.permute.xlu0 %784 }
 0x376   : > { %1732 = vpow2.f32 %v756_v60  ;;  %v751_v63 = vsub.f32 %v735_v45, %v747_v61  ;;  %v791_v1 = vsel %vm789_vm3, %v785_v62, 0 }
 0x377   : > { %1594 = vmatpush3.bf16.msra.mxu1 %v791_v1 }
 0x378   : > { %v758_v2 = vmul.f32 1.442695, %v751_v63  ;;  %1605 = vmatprep.subr.bf16.mxu1 %v1847_v0 }
 0x379   : > { %v834_v4 = vpop.permute.xlu1 %833 }
 0x37a   : > { %1734 = vpow2.f32 %v758_v2  ;;  %v839_v5 = vsel %vm789_vm3, %v834_v4, 0 }
 0x37b   : > { %1600 = vmatpush3.bf16.msra.mxu0 %v839_v5 }
 0x37c   : > { %v1731_v6 = vpop.eup %1730  ;;  %1611 = vmatprep.subr.bf16.mxu0 %v1847_v0 }
 0x37d   : > { %v763_v7 = vsel %vm538_vm2, %v1731_v6, 0.0 }
 0x37e   : > { %764 = vadd.xlane.f32.xlu1 %v763_v7 }
 0x380   : > { %v1733_v8 = vpop.eup %1732 }
 0x381   : > { %v766_v9 = vsel %vm538_vm2, %v1733_v8, 0.0 }
 0x382   : > { %767 = vadd.xlane.f32.xlu0 %v766_v9 }
 0x384   : > { %v1735_v10 = vpop.eup %1734 }
 0x385   : > { %v769_v11 = vsel %vm538_vm2, %v1735_v10, 0.0 }
 0x386   : > { %770 = vadd.xlane.f32.xlu1 %v769_v11 }
 0x397   : > { %881 = vrot.lane.b32.xlu1 %v2042_v18, %s1853_s23 }
 0x398   : > { %929 = vrot.lane.b32.xlu0 %v2040_v17, %s1853_s23  ;;  %s1523_s23 = sshll.u32 %s1946_s29, 7  ;;  %s1854_s29 = smov [#allocation5]  }
 0x399   : > { %s2188_s0 = scalar_lea.hbm %s2244_s13, %s1523_s23  ;;  %s1780_s16 = sshll.u32 %s1854_s29, 4  ;;  %s1781_s16 = int_to_ptr.vmem [resolvable:$false] %s1780_s16 }
 0x39a   : > { %s1782_s20 = scalar_lea.vmem %s1781_s16, 256  ;;  %p1783_p2 = scmp.lt.s32.totalorder %s2190_s21, %s1781_s16 }
 0x39b   : > { %p1784_p3 = scmp.lt.s32.totalorder %s1782_s20, %s1776_s14 }
 0x39d   : > { %p1785_p4 = por %p1784_p3, %p1783_p2 }
 0x39f   : > { %p1786_p7 = pnand %p1785_p4, %p1779_p12 }
 0x3a6   : > { %v762_v12 = vpop.xlane.xlu0 %761 }
 0x3a7   : > { %1736 = vrcp.f32 %v762_v12 }
 0x3b1   : > { %v1737_v13 = vpop.eup %1736 }
 0x3b2   : > { %v776_v14 = vmul.f32 %v1737_v13, %v1729_v53 }
 0x3b4   : > { %v780_v15 = vpack.c.bf16 %v776_v14, %v776_v14 }
 0x3b6   : > { %1596 = vmatmul.mubr.msk.bf16.vlgmr.msra.gmra.mrb[12].mxu1 %vm538_vm2, %v780_v15 }
 0x3b7   : > { %1607 = vmatprep.mubr.msk.bf16.mxu1 %vm1848_vm0, %v1847_v0 }
 0x40b   : > { %v765_v16 = vpop.xlane.xlu1 %764 }
 0x40c   : > { %1738 = vrcp.f32 %v765_v16 }
 0x40f   : > { %v768_v19 = vpop.xlane.xlu0 %767 }
 0x410   : > { %1740 = vrcp.f32 %v768_v19  ;;  %v1507_v19 = vld [vmem:[%s2235_s4] ss:$0 sm:$0xff] }
 0x413   : > { %v771_v20 = vpop.xlane.xlu1 %770  ;;  %v930_v17 = vpop.permute.xlu0 %929 }
 0x414   : > { %1742 = vrcp.f32 %v771_v20  ;;  %v935_v28 = vsel %vm789_vm3, %v930_v17, 0 }
 0x416   : > { %v1739_v18 = vpop.eup %1738 }
 0x417   : > { %v777_v21 = vmul.f32 %v1739_v18, %v1731_v6  ;;  %v882_v22 = vpop.permute.xlu1 %881 }
 0x418   : > { %v887_v23 = vsel %vm789_vm3, %v882_v22, 0 }
 0x419   : > { %1606 = vmatpush3.bf16.msra.mxu1 %v887_v23  ;;  %v781_v24 = vpack.c.bf16 %v777_v21, %v777_v21 }
 0x41a   : > { %v1741_v25 = vpop.eup %1740  ;;  %1617 = vmatprep.subr.bf16.mxu1 %v1847_v0 }
 0x41b   : > { %v778_v27 = vmul.f32 %v1741_v25, %v1733_v8  ;;  %1602 = vmatmul.mubr.msk.bf16.vlgmr.msra.gmra.mrb[8].mxu0 %vm538_vm2, %v781_v24 }
 0x41c   : > { %1612 = vmatpush3.bf16.msra.mxu0 %v935_v28  ;;  %1613 = vmatprep.mubr.msk.bf16.mxu0 %vm1848_vm0, %v1847_v0 }
 0x41d   : > { %v782_v29 = vpack.c.bf16 %v778_v27, %v778_v27  ;;  %1623 = vmatprep.subr.bf16.mxu0 %v1847_v0 }
 0x41e   : > { %v1743_v31 = vpop.eup %1742 }
 0x41f   : > { %v779_v33 = vmul.f32 %v1743_v31, %v1735_v10  ;;  %1608 = vmatmul.mubr.msk.bf16.vlgmr.msra.gmra.mrb[16].mxu1 %vm538_vm2, %v782_v29  ;;  %v1723_v31 = vld [vmem:[#allocation2 + $0x8] sm:$0xff]  }
 0x420   : > { %1618 = vmatpush3.bf16.msra.mxu1 %v989_v30  ;;  %1619 = vmatprep.mubr.msk.bf16.mxu1 %vm1848_vm0, %v1847_v0  ;;  %v1722_v30 = vld [vmem:[#allocation2] sm:$0xff]  }
 0x421   : > { %v783_v34 = vpack.c.bf16 %v779_v33, %v779_v33  ;;  %1629 = vmatprep.subr.bf16.mxu1 %v1847_v0 }
 0x423   : > { %1614 = vmatmul.mubr.msk.bf16.vlgmr.msra.gmra.mrb[12].mxu0 %vm538_vm2, %v783_v34 }
 0x424   : > { %1624 = vmatpush3.bf16.msra.mxu0 %v1035_v35  ;;  %1625 = vmatprep.mubr.msk.bf16.mxu0 %vm1848_vm0, %v1847_v0 }
 0x425   : > { %1635 = vmatprep.subr.bf16.mxu0 %v1847_v0 }
 0x489   : > { %v827_v37 = vpop.f32.mrb[12].mxu1 }
 0x48a   : > { %v977_v38 = vpack.c.bf16 %v827_v37, %v827_v37  ;;  %v1597_v39 = vpop.f32.mrb[13].mxu1  ;;  %v1508_v37 = vld [vmem:[%s2236_s5] ss:$0 sm:$0xff] }
 0x48b   : > { %v830_v41 = vpop.f32.mrb[14].mxu1  ;;  %v1509_v39 = vld [vmem:[%s2237_s6] ss:$0 sm:$0xff] }
 0x48c   : > { %v1598_v42 = vpop.f32.mrb[15].mxu1  ;;  %1620 = vmatmul.mubr.msk.bf16.vlgmr.msra.gmra.mrb[20].mxu1 %vm538_vm2, %v977_v38 }
 0x48d   : > { %1630 = vmatpush3.bf16.msra.mxu1 %v1081_v40  ;;  %1631 = vmatprep.mubr.msk.bf16.mxu1 %vm1848_vm0, %v1847_v0 }
 0x48e   : > { %1641 = vmatprep.subr.bf16.mxu1 %v1847_v0 }
 0x4ee   : > { %v875_v44 = vpop.f32.mrb[8].mxu0 }
 0x4ef   : > { %v978_v45 = vpack.c.bf16 %v875_v44, %v875_v44  ;;  %v1603_v46 = vpop.f32.mrb[9].mxu0  ;;  %v1727_v44 = vld [vmem:[%s2240_s9 + $0x18] sm:$0xff]  }
 0x4f0   : > { %v878_v48 = vpop.f32.mrb[10].mxu0 }
 0x4f1   : > { %v1604_v49 = vpop.f32.mrb[11].mxu0  ;;  %1626 = vmatmul.mubr.msk.bf16.vlgmr.msra.gmra.mrb[16].mxu0 %vm538_vm2, %v978_v45  ;;  %v1510_v45 = vld [vmem:[%s2239_s8] ss:$0 sm:$0xff] }
 0x4f2   : > { %v923_v50 = vpop.f32.mrb[16].mxu1  ;;  %1636 = vmatpush3.bf16.msra.mxu0 %v1127_v47  ;;  %1637 = vmatprep.mubr.msk.bf16.mxu0 %vm1848_vm0, %v1847_v0 }
 0x4f3   : > { %v979_v51 = vpack.c.bf16 %v923_v50, %v923_v50  ;;  %v1609_v52 = vpop.f32.mrb[17].mxu1  ;;  %1649 = vmatprep.subr.bf16.mxu0 %v1847_v0 }
 0x4f4   : > { %v926_v53 = vpop.f32.mrb[18].mxu1 }
 0x4f5   : > { %v1610_v54 = vpop.f32.mrb[19].mxu1  ;;  %1632 = vmatmul.mubr.msk.bf16.vlgmr.msra.gmra.mrb[24].mxu1 %vm538_vm2, %v979_v51 }
 0x4f6   : > { %v971_v55 = vpop.f32.mrb[12].mxu0  ;;  %1645 = vmatprep.mubr.msk.bf16.mxu1 %vm1848_vm0, %v1847_v0  ;;  %1642 = vmatpush3.bf16.msra.mxu1 %v1722_v30 }
 0x4f7   : > { %v980_v56 = vpack.c.bf16 %v971_v55, %v971_v55  ;;  %v1615_v57 = vpop.f32.mrb[13].mxu0  ;;  %1643 = vmatprep.subr.bf16.mxu1 %v1847_v0 }
 0x4f8   : > { %v974_v58 = vpop.f32.mrb[14].mxu0 }
 0x4f9   : > { %v1616_v59 = vpop.f32.mrb[15].mxu0  ;;  %1638 = vmatmul.mubr.msk.bf16.vlgmr.msra.gmra.mrb[20].mxu0 %vm538_vm2, %v980_v56 }
 0x4fa   : > { %1657 = vmatprep.mubr.msk.bf16.mxu0 %vm1848_vm0, %v1847_v0  ;;  %1644 = vmatpush3.bf16.msra.mxu1 %v1723_v31 }
 0x55f   : > { %v1025_v60 = vpop.f32.mrb[20].mxu1 }
 0x560   : > { %v1621_v61 = vpop.f32.mrb[21].mxu1  ;;  %v1169_v2 = vsel %vm477_vm1, %v1025_v60, 0.0 }
 0x561   : > { %v1028_v62 = vpop.f32.mrb[22].mxu1 }
 0x562   : > { %v1622_v63 = vpop.f32.mrb[23].mxu1 }
 0x5c4   : > { %v1071_v1 = vpop.f32.mrb[16].mxu0 }
 0x5c5   : > { %v1170_v4 = vsel %vm477_vm1, %v1071_v1, 0.0  ;;  %v1627_v5 = vpop.f32.mrb[17].mxu0 }
 0x5c6   : > { %v1171_v6 = vadd.f32 %v1170_v4, %v1169_v2  ;;  %v1074_v7 = vpop.f32.mrb[18].mxu0 }
 0x5c7   : > { %v1628_v8 = vpop.f32.mrb[19].mxu0  ;;  %v1520_v7 = vld [vmem:[%s2242_s11] ss:$0 sm:$0xff] }
 0x5c8   : > { %v1117_v9 = vpop.f32.mrb[24].mxu1 }
 0x5c9   : > { %v1172_v10 = vsel %vm477_vm1, %v1117_v9, 0.0  ;;  %v1633_v11 = vpop.f32.mrb[25].mxu1  ;;  %v1521_v9 = vld [vmem:[%s2243_s12] ss:$0 sm:$0xff] }
 0x5ca   : > { %v1173_v12 = vadd.f32 %v1172_v10, %v1171_v6  ;;  %v1120_v13 = vpop.f32.mrb[26].mxu1 }
 0x5cb   : > { %v1634_v14 = vpop.f32.mrb[27].mxu1 }
 0x5cc   : > { %v1163_v15 = vpop.f32.mrb[20].mxu0 }
 0x5cd   : > { %v1174_v16 = vsel %vm477_vm1, %v1163_v15, 0.0  ;;  %v1639_v20 = vpop.f32.mrb[21].mxu0 }
 0x5ce   : > { %v1175_v18 = vadd.f32 %v1174_v16, %v1173_v12  ;;  %v1166_v21 = vpop.f32.mrb[22].mxu0 }
 0x5cf   : > { %v1640_v22 = vpop.f32.mrb[23].mxu0 }
 0x5d0   : > { %v1183_v17 = vadd.f32 %v1507_v19, %v1175_v18 }
 0x5d2   : > { %v1184_v23 = vadd.f32 %v1183_v17, %v2025_v3  ;;  %v1724_v3 = vld [vmem:[%s2240_s9] sm:$0xff]  }
 0x5d3   : > { %1650 = vmatpush3.bf16.msra.mxu0 %v1724_v3 }
 0x5d4   : > { %v1187_v24 = vsel %vm477_vm1, %v1184_v23, 0.0  ;;  %1651 = vmatprep.subr.bf16.mxu0 %v1847_v0 }
 0x5d5   : > { %1188 = vadd.xlane.f32.xlu1 %v1187_v24 }
 0x5d7   : > { %1652 = vmatpush3.bf16.msra.mxu0 %v1725_v32 }
 0x5d8   : > { %1653 = vmatprep.subr.bf16.mxu0 %v1847_v0 }
 0x5db   : > { %1654 = vmatpush3.bf16.msra.mxu0 %v1726_v43 }
 0x5dc   : > { %1655 = vmatprep.subr.bf16.mxu0 %v1847_v0  ;;  %v1514_v0 = vld [vmem:[%s2241_s10] ss:$0 sm:$0xff] }
 0x5df   : > { %1656 = vmatpush3.bf16.msra.mxu0 %v1727_v44 }
 0x662   : > { %v1189_v25 = vpop.xlane.xlu1 %1188 }
 0x663   : > { %v1191_v26 = vmul.f32 0.03125, %v1189_v25 }
 0x665   : > { %v1192_v27 = vsub.f32 %v1184_v23, %v1191_v26 }
 0x667   : > { %v1193_v28 = vmul.f32 %v1192_v27, %v1192_v27 }
 0x669   : > { %v1194_v29 = vsel %vm477_vm1, %v1193_v28, 0.0 }
 0x66a   : > { %1195 = vadd.xlane.f32.xlu0 %v1194_v29 }
 0x6f7   : > { %v1196_v33 = vpop.xlane.xlu0 %1195 }
 0x6f8   : > { %v1197_v34 = vmul.f32 0.03125, %v1196_v33 }
 0x6fa   : > { %v1198_v35 = vadd.f32 1e-05, %v1197_v34 }
 0x6fc   : > { %1744 = vrsqrt.f32 %v1198_v35 }
 0x706   : > { %v1745_v36 = vpop.eup %1744 }
 0x707   : > { %v1200_v38 = vmul.f32 %v1745_v36, %v1192_v27 }
 0x709   : > { %v1207_v40 = vmul.f32 %v1508_v37, %v1200_v38 }
 0x70b   : > { %v1214_v41 = vadd.f32 %v1509_v39, %v1207_v40 }
 0x70d   : > { %v1215_v42 = vpack.c.bf16 %v1214_v41, %v1214_v41 }
 0x70f   : > { %1646 = vmatmul.mubr.msk.bf16.vlgmr.msra.gmra.mrb[28].mxu1 %vm477_vm1, %v1215_v42 }
 0x7e2   : > { %v1276_v46 = vpop.f32.mrb[28].mxu1 }
 0x7e3   : > { %v1277_v47 = vadd.f32 %v1510_v45, %v1276_v46  ;;  %v1647_v48 = vpop.f32.mrb[29].mxu1 }
 0x7e4   : > { %v1279_v49 = vpop.f32.mrb[30].mxu1 }
 0x7e5   : > { %v1282_v50 = vmax.f32 %v1277_v47, 0.0  ;;  %v1648_v51 = vpop.f32.mrb[31].mxu1 }
 0x7e7   : > { %v1283_v52 = vpack.c.bf16 %v1282_v50, %v1282_v50 }
 0x7e9   : > { %1658 = vmatmul.mubr.msk.bf16.vlgmr.msra.gmra.mrb[24].mxu0 %vm1323_vm4, %v1283_v52 }
 0x8bc   : > { %v1361_v53 = vpop.f32.mrb[24].mxu0 }
 0x8bd   : > { %v1362_v54 = vadd.f32 %v1514_v0, %v1361_v53  ;;  %v1659_v55 = vpop.f32.mrb[25].mxu0 }
 0x8be   : > { %v1364_v56 = vpop.f32.mrb[26].mxu0 }
 0x8bf   : > { %v1660_v57 = vpop.f32.mrb[27].mxu0  ;;  %v1367_v58 = vadd.f32 %v1362_v54, %v1214_v41 }
 0x8c1   : > { %v1370_v59 = vsel %vm477_vm1, %v1367_v58, 0.0 }
 0x8c2   : > { %1371 = vadd.xlane.f32.xlu0 %v1370_v59 }
 0x94f   : > { %v1372_v60 = vpop.xlane.xlu0 %1371 }
 0x950   : > { %v1373_v61 = vmul.f32 0.03125, %v1372_v60 }
 0x952   : > { %v1374_v62 = vsub.f32 %v1367_v58, %v1373_v61 }
 0x954   : > { %v1375_v63 = vmul.f32 %v1374_v62, %v1374_v62 }
 0x956   : > { %v1376_v1 = vsel %vm477_vm1, %v1375_v63, 0.0 }
 0x957   : > { %1377 = vadd.xlane.f32.xlu1 %v1376_v1 }
 0x9e4   : > { %v1378_v2 = vpop.xlane.xlu1 %1377 }
 0x9e5   : > { %v1379_v4 = vmul.f32 0.03125, %v1378_v2 }
 0x9e7   : > { %v1380_v5 = vadd.f32 1e-05, %v1379_v4 }
 0x9e9   : > { %1746 = vrsqrt.f32 %v1380_v5 }
 0x9f3   : > { %v1747_v6 = vpop.eup %1746 }
 0x9f4   : > { %v1382_v8 = vmul.f32 %v1747_v6, %v1374_v62 }
 0x9f6   : > { %v1389_v10 = vmul.f32 %v1520_v7, %v1382_v8 }
 0x9f8   : > { %v1396_v11 = vadd.f32 %v1521_v9, %v1389_v10 }
 0x9fa   : > { %1397 = vst.msk [vmem:[%s446_s15] sm:$0xff] %vm477_vm1, %v1396_v11 }
 0x9fb   : > { %1789 = shalt.err (!%p1786_p7)
}
 0x9fc   : > { %s1790_s30 = scalar_lea.hbm %s2188_s0, 128  ;;  %s1794_s15 = scalar_lea.hbm %s2244_s13, 256 }
 0x9fd   : > { %p1791_p8 = scmp.ne.s32.totalorder %s2188_s0, %s1790_s30  ;;  %p1795_p1 = scmp.lt.u32.totalorder %s2188_s0, %s2244_s13 }
 0x9fe   : > { %p1796_p0 = scmp.lt.u32.totalorder %s1794_s15, %s1790_s30  ;;  %p1798_p6 = scmp.lt.u32.totalorder %s1790_s30, %s2188_s0 }
 0x9ff   : > { %p1792_p11 = pnand %p1791_p8, %p2263_p9 }
 0xa00   : > { %p1797_p5 = por %p1796_p0, %p1795_p1 }
 0xa01   : > { %p1793_p13 = pneg %p1792_p11 }
 0xa02   : > { %p1799_p10 = por %p1798_p6, %p1797_p5 }
 0xa04   : > { %p1800_p12 = pnand %p1799_p10, %p1793_p13 }
 0xa06   : > { %1803 = shalt.err (!%p1800_p12)
}
 0xa07   : > { %1665 = dma.vmem_to_hbm [thread:$0]  (%p2263_p9), %s2190_s21, 128, %s2188_s0, %s1399_s27  }
 0xa08 PF: > { %p1677_p2 = scmp.ge.s32.totalorder %s1842_s28, 2  ;;  %s1424_s14 = sand.u32 1, %s1830_s25  }
 0xa09   : > { %p2264_p3 = scmp.ne.s32.totalorder %s2256_s19, 0  ;;  %s1425_s29 = scalar_lea.sflag [#allocation4], %s1424_s14 }
 0xa0b   : > { %p1672_p4 = pnand %p1677_p2, %p2264_p3 }
 0xa0d   : > { %1825 = dma.done.wait (!%p1672_p4), %s1425_s29, 128  }
 0xa0e   : > { %1827 = vsyncadd (!%p1672_p4), %s1425_s29, 4294967168  ;;  %s2265_s28 = sld [smem:[#allocation9_spill]]  ;;  %s2266_s16 = sld [smem:[#allocation8_spill]] }
 0xa0f   : > { %s2267_s27 = sld [smem:[#allocation10_spill]]  ;;  %s2268_s25 = smov %s1834_s26 }
 0xa14   : > { %p24_p7 = scmp.ge.s32.totalorder %s2265_s28, 4   ;;  %s2269_s26 = smov %s2266_s16 }
 0xa16   :  { %26 = sbr.rel (!%p24_p7) target bundleno = 6 (0x6), region = 112 }
 0xa1d   :  { %1430 = vsyncpa [#allocation3], 1 }
 0xa1e   :  { %1432 = vsyncpa [#allocation3 + $0x1], 1 }
 0xa1f   :  { %1433 = vsyncpa [#allocation4], 1 }
 0xa20   :  { %1435 = vsyncpa [#allocation4 + $0x1], 1 }

</bundles_post_ra>
